<compile_context>
chip_gen: v7x
topology: tpu7x:2x2x1
jax: 0.10.0
libtpu: 0.0.40
codegen_flags: <defaults>
</compile_context>

<pallas_src>
import jax
import jax.numpy as jnp
from jax.experimental import pallas as pl
from jax.experimental.pallas import tpu as pltpu

_LANE = 128
_SMALL_SLAB_BYTES = 256 * 1024           # below this: single block, grid=(1,)
_TARGET_BLOCK_BYTES = 4 * 1024 * 1024    # ~4 MiB per input block
_MIN_GRID_STEPS = 4                      # enough steps to pipeline + shard 2 TCs
_VMEM_LIMIT_BYTES = 32 * 1024 * 1024     # 3 streams x 2 bufs x 4 MiB = 24 MiB fits


def _sensor_kernel(re_ref, im_ref, o_ref):
    re = re_ref[...]
    im = im_ref[...]
    # re^2 + im^2 on the VPU; tanh on the EUP (separate bundle slot).
    o_ref[...] = jnp.tanh(re * re + im * im)


def _choose_wide(n):
    """Largest multiple of 128 (<= 4096) that divides n (requires n % 128 == 0)."""
    for cand in range(4096, _LANE - 1, -_LANE):
        if n % cand == 0:
            return cand
    return _LANE  # unreachable when n % 128 == 0


def sensor_forward(real_part, imag_part):
    """Sensor.forward on a complex field given as (real, imag) float planes.

    Returns tanh(re^2 + im^2) with the same shape as the inputs, float32.
    """
    assert real_part.shape == imag_part.shape
    orig_shape = real_part.shape
    n = real_part.size
    if n == 0:
        return jnp.zeros(orig_shape, jnp.float32)

    if n % _LANE == 0:
        # Lane-dense slab: wide multiple of 128 -> unmasked vector stores.
        wide = _choose_wide(n)
    else:
        # No pad / no slice: keep the original trailing dim as a full-extent
        # block dim (the (8,128) rule is waived for full-extent dims).
        wide = orig_shape[-1] if len(orig_shape) >= 1 else 1
    rows = n // wide

    re2d = jnp.ravel(real_part).astype(jnp.float32).reshape(rows, wide)
    im2d = jnp.ravel(imag_part).astype(jnp.float32).reshape(rows, wide)

    bytes_per_row = wide * 4
    total_bytes = rows * bytes_per_row

    if total_bytes <= _SMALL_SLAB_BYTES:
        # Tiny input: one full-array block, single grid step.
        block_rows = rows
    else:
        # Tile even when the whole array would fit one block, so DMA overlaps
        # compute and v7x megacore sharding kicks in.
        steps = max(_MIN_GRID_STEPS, pl.cdiv(total_bytes, _TARGET_BLOCK_BYTES))
        if steps % 2:
            steps += 1  # even grid -> balanced across v7x's two TensorCores
        block_rows = pl.cdiv(rows, steps)
        block_rows = min(rows, ((block_rows + 7) // 8) * 8)  # sublane multiple
        # Rounding to 8 can change the step count; nudge back toward an even grid.
        if block_rows > 8 and pl.cdiv(rows, block_rows) % 2 != 0:
            for br in range(block_rows - 8, 7, -8):
                if pl.cdiv(rows, br) % 2 == 0:
                    block_rows = br
                    break
    grid_len = pl.cdiv(rows, block_rows)

    block = (block_rows, wide)
    index_map = lambda i: (i, 0)

    out2d = pl.pallas_call(
        _sensor_kernel,
        out_shape=jax.ShapeDtypeStruct((rows, wide), jnp.float32),
        grid_spec=pltpu.PrefetchScalarGridSpec(
            num_scalar_prefetch=0,
            grid=(grid_len,),
            in_specs=[
                pl.BlockSpec(block, index_map),
                pl.BlockSpec(block, index_map),
            ],
            out_specs=pl.BlockSpec(block, index_map),
        ),
        compiler_params=pltpu.CompilerParams(
            dimension_semantics=("parallel",),
            vmem_limit_bytes=_VMEM_LIMIT_BYTES,
        ),
        cost_estimate=pl.CostEstimate(
            flops=3 * n, transcendentals=n, bytes_accessed=12 * n),
    )(re2d, im2d)

    return out2d.reshape(orig_shape)


def sensor_forward_complex(input_field):
    """Convenience wrapper matching the PyTorch signature (complex input).

    NOTE: materializing .real / .imag here is an extra HBM pass done by XLA.
    # TODO(synk): fuse tanh(|z|^2) as an epilogue of the kernel that produces
    # the field (or bitcast the interleaved complex buffer and de-interleave
    # in-kernel) to remove that round trip.
    """
    return sensor_forward(jnp.real(input_field), jnp.imag(input_field))


if __name__ == "__main__":
    def _ref(re, im):
        return jnp.tanh(re * re + im * im)

    def _check(shape, seed):
        k_re, k_im = jax.random.split(jax.random.PRNGKey(seed))
        re = jax.random.normal(k_re, shape, dtype=jnp.float32)
        im = jax.random.normal(k_im, shape, dtype=jnp.float32)
        out = jax.block_until_ready(sensor_forward(re, im))
        assert out.shape == shape
        assert out.dtype == jnp.float32
        assert jnp.allclose(out, _ref(re, im), atol=1e-6, rtol=1e-6)

    # 1) Tiny NCHW field: single-block path, grid=(1,).
    _check((2, 4, 16, 16), 0)
    # 2) Mid-size field: tiled path, even grid (4 steps), 4096-lane slab.
    _check((2, 4, 128, 256), 1)
    # 3) Rows not divisible by block rows: partial trailing block path.
    _check((2, 4, 88, 512), 2)
    # 4) n % 128 != 0: no-pad path, full-extent trailing block dims.
    _check((3, 5, 17, 19), 3)
    # 5) Complex-input convenience wrapper (matches the PyTorch signature).
    kz_r, kz_i = jax.random.split(jax.random.PRNGKey(4))
    z = (jax.random.normal(kz_r, (2, 4, 16, 16), dtype=jnp.float32)
         + 1j * jax.random.normal(kz_i, (2, 4, 16, 16), dtype=jnp.float32))
    out_c = jax.block_until_ready(sensor_forward_complex(z))
    ref_c = jnp.tanh(jnp.real(z) ** 2 + jnp.imag(z) ** 2)
    assert jnp.allclose(out_c, ref_c, atol=1e-6, rtol=1e-6)

    print("KERNEL_OK")
</pallas_src>

<mosaic_0001>
module attributes {stable_mosaic.version = 11 : i64} {
  func.func @_sensor_kernel(%arg0: i32, %arg1: memref<1x2048xf32, #tpu.memory_space<vmem>>, %arg2: memref<1x2048xf32, #tpu.memory_space<vmem>>, %arg3: memref<1x2048xf32, #tpu.memory_space<vmem>>) attributes {dimension_semantics = [#tpu.dimension_semantics<parallel>], iteration_bounds = array<i64: 1>, scalar_prefetch = 0 : i64, scratch_operands = 0 : i64, tpu.core_type = #tpu.core_type<tc>, window_params = [{transform_indices = @transform_0, window_bounds = array<i64: 1, 2048>}, {transform_indices = @transform_1, window_bounds = array<i64: 1, 2048>}, {transform_indices = @transform_2, window_bounds = array<i64: 1, 2048>}]} {
    %c0 = arith.constant 0 : index
    %c0_0 = arith.constant 0 : index
    %0 = vector.load %arg1[%c0, %c0_0] : memref<1x2048xf32, #tpu.memory_space<vmem>>, vector<1x2048xf32>
    %c0_1 = arith.constant 0 : index
    %c0_2 = arith.constant 0 : index
    %1 = vector.load %arg2[%c0_1, %c0_2] : memref<1x2048xf32, #tpu.memory_space<vmem>>, vector<1x2048xf32>
    %2 = arith.mulf %0, %0 : vector<1x2048xf32>
    %3 = arith.mulf %1, %1 : vector<1x2048xf32>
    %4 = arith.addf %2, %3 : vector<1x2048xf32>
    %5 = math.tanh %4 : vector<1x2048xf32>
    %c0_3 = arith.constant 0 : index
    %c0_4 = arith.constant 0 : index
    %6 = vector.load %arg3[%c0_3, %c0_4] : memref<1x2048xf32, #tpu.memory_space<vmem>>, vector<1x2048xf32>
    tpu.vector_store %arg3[%c0_3, %c0_4], %5 {strides = array<i32>} : memref<1x2048xf32, #tpu.memory_space<vmem>>, vector<1x2048xf32>,
    return
  }
  func.func @transform_0(%arg0: i32) -> (i32, i32) {
    %c0_i32 = arith.constant 0 : i32
    %c0_i32_0 = arith.constant 0 : i32
    return %arg0, %c0_i32 : i32, i32
  }
  func.func @transform_1(%arg0: i32) -> (i32, i32) {
    %c0_i32 = arith.constant 0 : i32
    %c0_i32_0 = arith.constant 0 : i32
    return %arg0, %c0_i32 : i32, i32
  }
  func.func @transform_2(%arg0: i32) -> (i32, i32) {
    %c0_i32 = arith.constant 0 : i32
    %c0_i32_0 = arith.constant 0 : i32
    return %arg0, %c0_i32 : i32, i32
  }
}

</mosaic_0001>

<bundles_post_ra>
// kernel: tpu_custom_call.1
= control target key start
LH: loop header
LB: loop body
LE: loop exit
PB: predicated region body
PF: predicated region fallthrough
CT: control target
= control target key end

     0   :  { %7 = vsyncpa [#allocation3], 0  ;;  %s199_s0 = inlined_call_operand.hbm [shape: f32[1,2048], index: 0, kind: input, shape index: {}]   ;;  %s200_s1 = inlined_call_operand.hbm [shape: f32[1,2048], index: 1, kind: input, shape index: {}]   ;;  %s201_s2 = inlined_call_operand.hbm [shape: f32[1,2048], index: 2, kind: output, shape index: {}]  }
   0x1   :  { %8 = vsyncpa [#allocation6], 0 }
   0x2   :  { %9 = vsyncpa [#allocation4], 0  ;;  %s145_s9 = smov [#allocation2]   ;;  %s146_s11 = smov [#allocation5]  }
   0x3   :  { %s16_s10 = sshll.u32 %s145_s9, 4  ;;  %s26_s12 = sshll.u32 %s146_s11, 4  ;;  %s17_s10 = int_to_ptr.vmem [resolvable:$true] %s16_s10  ;;  %s27_s12 = int_to_ptr.vmem [resolvable:$true] %s26_s12 }
   0x4   :  { %s73_s15 = scalar_lea.hbm %s199_s0, 256 }
   0x5   :  { %p74_p0 = scmp.ne.s32.totalorder %s199_s0, %s73_s15  ;;  %p77_p1 = scmp.lt.u32.totalorder %s73_s15, %s199_s0 }
   0x7   :  { %p79_p2 = pnand %p77_p1, %p74_p0 }
   0x9   :  { %82 = shalt.err (!%p79_p2)
}
   0xa   :  { %s83_s20 = scalar_lea.vmem %s17_s10, 256  ;;  %p88_p4 = scmp.lt.s32.totalorder %s17_s10, %s17_s10 }
   0xb   :  { %p84_p3 = scmp.ne.s32.totalorder %s17_s10, %s83_s20  ;;  %p89_p5 = scmp.lt.s32.totalorder %s83_s20, %s83_s20 }
   0xd   :  { %p90_p6 = por %p89_p5, %p88_p4 }
   0xf   :  { %p91_p7 = pnand %p90_p6, %p84_p3 }
  0x11   :  { %94 = shalt.err (!%p91_p7)
}
  0x12   :  { %19 = dma.hbm_to_vmem [thread:$0]  %s199_s0, 256, %s17_s10, [#allocation3]  }
  0x13   :  { %s95_s25 = scalar_lea.hbm %s200_s1, 256 }
  0x14   :  { %p96_p8 = scmp.ne.s32.totalorder %s200_s1, %s95_s25  ;;  %p99_p9 = scmp.lt.u32.totalorder %s95_s25, %s200_s1 }
  0x16   :  { %p101_p10 = pnand %p99_p9, %p96_p8 }
  0x18   :  { %104 = shalt.err (!%p101_p10)
}
  0x19   :  { %s105_s30 = scalar_lea.vmem %s27_s12, 256  ;;  %p110_p12 = scmp.lt.s32.totalorder %s27_s12, %s27_s12 }
  0x1a   :  { %p106_p11 = scmp.ne.s32.totalorder %s27_s12, %s105_s30  ;;  %p111_p13 = scmp.lt.s32.totalorder %s105_s30, %s105_s30 }
  0x1c   :  { %p112_p0 = por %p111_p13, %p110_p12 }
  0x1e   :  { %p113_p1 = pnand %p112_p0, %p106_p11 }
  0x20   :  { %116 = shalt.err (!%p113_p1)
}
  0x21   :  { %29 = dma.hbm_to_vmem [thread:$0]  %s200_s1, 256, %s27_s12, [#allocation6]  }
  0x22   :  { %139 = dma.done.wait [#allocation3], 256  }
  0x23   :  { %140 = vsyncadd [#allocation3], 4294967040 }
  0x24   :  { %141 = dma.done.wait [#allocation6], 256  }
  0x25   :  { %142 = vsyncadd [#allocation6], 4294967040  ;;  %v36_v0 = vld [vmem:[#allocation2] sm:$0xff]  ;;  %v38_v1 = vld [vmem:[#allocation5] sm:$0xff]  ;;  %s147_s4 = smov [#allocation7]  }
  0x26   :  { %v37_v2 = vld [vmem:[#allocation2 + $0x8] sm:$0xff]  ;;  %v40_v3 = vmul.f32 %v36_v0, %v36_v0  ;;  %v42_v4 = vmul.f32 %v38_v1, %v38_v1  ;;  %v39_v5 = vld [vmem:[#allocation5 + $0x8] sm:$0xff]  ;;  %s56_s5 = sshll.u32 %s147_s4, 4  ;;  %s57_s5 = int_to_ptr.vmem [resolvable:$true] %s56_s5 }
  0x27   :  { %v41_v6 = vmul.f32 %v37_v2, %v37_v2  ;;  %v43_v7 = vmul.f32 %v39_v5, %v39_v5  ;;  %s117_s1 = scalar_lea.vmem %s57_s5, 256  ;;  %p122_p3 = scmp.lt.s32.totalorder %s57_s5, %s57_s5 }
  0x28   :  { %v44_v8 = vadd.f32 %v42_v4, %v40_v3  ;;  %p118_p2 = scmp.ne.s32.totalorder %s57_s5, %s117_s1  ;;  %p123_p4 = scmp.lt.s32.totalorder %s117_s1, %s117_s1 }
  0x29   :  { %v45_v9 = vadd.f32 %v43_v7, %v41_v6 }
  0x2a   :  { %69 = vtanh.f32 %v44_v8  ;;  %p124_p5 = por %p123_p4, %p122_p3 }
  0x2b   :  { %71 = vtanh.f32 %v45_v9 }
  0x2c   :  { %p125_p6 = pnand %p124_p5, %p118_p2 }
  0x34   :  { %v70_v10 = vpop.eup %69 }
  0x35   :  { %v72_v11 = vpop.eup %71  ;;  %48 = vst [vmem:[#allocation7] sm:$0xff] %v70_v10 }
  0x36   :  { %49 = vst [vmem:[#allocation7 + $0x8] sm:$0xff] %v72_v11 }
  0x37   :  { %128 = shalt.err (!%p125_p6)
}
  0x38   :  { %s129_s8 = scalar_lea.hbm %s201_s2, 256 }
  0x39   :  { %p130_p7 = scmp.ne.s32.totalorder %s201_s2, %s129_s8  ;;  %p133_p8 = scmp.lt.u32.totalorder %s129_s8, %s201_s2 }
  0x3b   :  { %p135_p9 = pnand %p133_p8, %p130_p7 }
  0x3d   :  { %138 = shalt.err (!%p135_p9)
}
  0x3e   :  { %59 = dma.vmem_to_hbm [thread:$0]  %s57_s5, 256, %s201_s2, [#allocation4]  }
  0x3f   :  { %143 = dma.done.wait [#allocation4], 256  }
  0x40   :  { %144 = vsyncadd [#allocation4], 4294967040 }
  0x41   :  { %63 = vsyncpa [#allocation3], 1 }
  0x42   :  { %64 = vsyncpa [#allocation6], 1 }
  0x43   :  { %65 = vsyncpa [#allocation4], 1 }

</bundles_post_ra>
